<compile_context>
chip_gen: v7x
topology: tpu7x:2x2x1
jax: 0.10.0
libtpu: 0.0.40
codegen_flags: <defaults>
</compile_context>

<pallas_src>
import math

import jax
import jax.numpy as jnp
from jax.experimental import pallas as pl
from jax.experimental.pallas import tpu as pltpu


def _make_dma_copy_kernel(chunks):
    """Kernel copying static `chunks` of the leading axis via HBM->HBM DMA.

    `chunks` is a static Python list of (start_row, num_rows) tuples.
    Kernel signature: (x_hbm_ref, o_hbm_ref, dma_sems).
    """

    def kernel(x_hbm, o_hbm, sems):
        copies = []
        for i, (start, size) in enumerate(chunks):
            src = x_hbm.at[pl.ds(start, size)]
            dst = o_hbm.at[pl.ds(start, size)]
            copies.append(pltpu.make_async_copy(src, dst, sems.at[i]))
        # Issue every DMA first (several outstanding), then wait on all.
        for cp in copies:
            cp.start()
        for cp in copies:
            cp.wait()

    return kernel


def _split_chunks(lead, is_2d):
    """Static chunking: up to 4 outstanding DMAs, only when the copy is large.

    Chunk boundaries are kept 8-row aligned for the 2-D (rows, 128) view so
    each chunk is a whole number of (8, 128) tiles.
    """
    # ~4 MiB f32 per chunk target before splitting pays off.
    target_lead = 8192 if is_2d else 8192 * 128
    n_chunks = max(1, min(4, -(-lead // target_lead)))

    chunks = []
    if n_chunks == 1:
        return [(0, lead)]

    align = 8 if is_2d else 1
    base = lead // n_chunks
    base -= base % align  # aligned base size; remainder goes to the last chunk
    start = 0
    for i in range(n_chunks):
        size = base if i < n_chunks - 1 else lead - start
        if size > 0:
            chunks.append((start, size))
            start += size
    return chunks


def squeeze_dim_neg6(a: jax.Array) -> jax.Array:
    """Equivalent of torch.squeeze(a, -6) for a 6-D input with leading dim 1."""
    assert a.ndim == 6, "expected a 6-D input"
    assert a.shape[0] == 1, "dim -6 must be size 1 to be squeezed"
    out_shape = a.shape[1:]

    total = math.prod(a.shape)
    assert total > 0

    # Lane-dense 2-D view when possible.  For this module 384 = 3 * 128, so
    # total % 128 == 0 always; the flat 1-D fallback is only for generality
    # and is still a plain bulk DMA (no masked vector stores involved).
    if total % 128 == 0:
        view_shape = (total // 128, 128)
    else:
        view_shape = (total,)

    chunks = _split_chunks(view_shape[0], len(view_shape) == 2)

    x_view = a.reshape(view_shape)

    out_view = pl.pallas_call(
        _make_dma_copy_kernel(chunks),
        out_shape=jax.ShapeDtypeStruct(view_shape, a.dtype),
        grid_spec=pltpu.PrefetchScalarGridSpec(
            num_scalar_prefetch=0,
            grid=(1,),
            in_specs=[pl.BlockSpec(memory_space=pl.ANY)],   # raw HBM ref
            out_specs=pl.BlockSpec(memory_space=pl.ANY),    # raw HBM ref
            scratch_shapes=[pltpu.SemaphoreType.DMA((len(chunks),))],
        ),
        compiler_params=pltpu.CompilerParams(
            dimension_semantics=("arbitrary",),
        ),
    )(x_view)

    return out_view.reshape(out_shape)


if __name__ == "__main__":
    key = jax.random.PRNGKey(0)
    # Small shapes consistent with the annotation [1, -1, 1, 384, -1, 1]:
    # B = 2 (dynamic), 384 fixed, C = 4 (dynamic).
    a = jax.random.normal(key, (1, 2, 1, 384, 4, 1), dtype=jnp.float32)

    out = squeeze_dim_neg6(a)
    out = jax.block_until_ready(out)

    # Sanity checks against the reference semantics (jnp.squeeze on axis 0).
    ref = jnp.squeeze(a, axis=0)
    assert out.shape == (2, 1, 384, 4, 1), out.shape
    assert out.dtype == jnp.float32
    assert bool(jnp.array_equal(out, ref))

    print("KERNEL_OK")
</pallas_src>

<mosaic_0001>
module attributes {stable_mosaic.version = 11 : i64} {
  func.func @kernel(%arg0: i32, %arg1: memref<24x128xf32, #tpu.memory_space<any>>, %arg2: memref<24x128xf32, #tpu.memory_space<any>>, %arg3: memref<1x!tpu.dma_semaphore, #tpu.memory_space<semaphore_mem>>) attributes {dimension_semantics = [#tpu.dimension_semantics<arbitrary>], iteration_bounds = array<i64: 1>, scalar_prefetch = 0 : i64, scratch_operands = 1 : i64, tpu.core_type = #tpu.core_type<tc>, window_params = [{}, {}]} {
    %c0_i32 = arith.constant 0 : i32
    %c0_i32_0 = arith.constant 0 : i32
    %c0_i32_1 = arith.constant 0 : i32
    %0 = tpu.memref_slice %arg1[%c0_i32_0, %c0_i32_1] : memref<24x128xf32, #tpu.memory_space<any>> -> memref<24x128xf32, #tpu.memory_space<any>>
    %c0_i32_2 = arith.constant 0 : i32
    %c0_i32_3 = arith.constant 0 : i32
    %1 = tpu.memref_slice %arg2[%c0_i32_2, %c0_i32_3] : memref<24x128xf32, #tpu.memory_space<any>> -> memref<24x128xf32, #tpu.memory_space<any>>
    %2 = tpu.memref_slice %arg3[%c0_i32] : memref<1x!tpu.dma_semaphore, #tpu.memory_space<semaphore_mem>> -> memref<1x!tpu.dma_semaphore, #tpu.memory_space<semaphore_mem>>
    %3 = tpu.memref_squeeze %2 : memref<1x!tpu.dma_semaphore, #tpu.memory_space<semaphore_mem>> -> memref<!tpu.dma_semaphore, #tpu.memory_space<semaphore_mem>>
    tpu.enqueue_dma source(%0 : memref<24x128xf32, #tpu.memory_space<any>>) target(%1 : memref<24x128xf32, #tpu.memory_space<any>>) target_semaphore(%3 : memref<!tpu.dma_semaphore, #tpu.memory_space<semaphore_mem>>)
    %c0_i32_4 = arith.constant 0 : i32
    %c0_i32_5 = arith.constant 0 : i32
    %c0_i32_6 = arith.constant 0 : i32
    %4 = tpu.memref_slice %arg1[%c0_i32_5, %c0_i32_6] : memref<24x128xf32, #tpu.memory_space<any>> -> memref<24x128xf32, #tpu.memory_space<any>>
    %c0_i32_7 = arith.constant 0 : i32
    %c0_i32_8 = arith.constant 0 : i32
    %5 = tpu.memref_slice %arg2[%c0_i32_7, %c0_i32_8] : memref<24x128xf32, #tpu.memory_space<any>> -> memref<24x128xf32, #tpu.memory_space<any>>
    %6 = tpu.memref_slice %arg3[%c0_i32_4] : memref<1x!tpu.dma_semaphore, #tpu.memory_space<semaphore_mem>> -> memref<1x!tpu.dma_semaphore, #tpu.memory_space<semaphore_mem>>
    %7 = tpu.memref_squeeze %6 : memref<1x!tpu.dma_semaphore, #tpu.memory_space<semaphore_mem>> -> memref<!tpu.dma_semaphore, #tpu.memory_space<semaphore_mem>>
    tpu.wait_dma2 semaphore(%7 : memref<!tpu.dma_semaphore, #tpu.memory_space<semaphore_mem>>) src(%4 : memref<24x128xf32, #tpu.memory_space<any>>) dst(%5 : memref<24x128xf32, #tpu.memory_space<any>>)
    return
  }
}

</mosaic_0001>

<bundles_post_ra>
// kernel: tpu_custom_call.1
= control target key start
LH: loop header
LB: loop body
LE: loop exit
PB: predicated region body
PF: predicated region fallthrough
CT: control target
= control target key end

     0   :  { %s34_s6 = smov [#allocation2]   ;;  %s35_s7 = smov [#allocation3]   ;;  %s53_s0 = inlined_call_operand.hbm [shape: f32[24,128], index: 0, kind: input, shape index: {}]   ;;  %s54_s1 = inlined_call_operand.hbm [shape: f32[24,128], index: 1, kind: output, shape index: {}]  }
   0x1   :  { %s36_s8 = smov 0  }
   0x2   :  { %18 = dma.general %s53_s0, 384, %s54_s1, %s34_s6, %s35_s7, [#allocation4], %s36_s8, 0  }
   0x3   :  { %32 = dma.done.wait [#allocation2], 384 }
   0x4   :  { %33 = vsyncadd [#allocation2], 4294966912 }
   0x5   :  { %22 = vsyncmov [#allocation2] }
   0x8   :  { %s23_s13 = vpop.sfrf %22 }
   0x9   :  { %p28_p0 = scmp.ne.s32.totalorder %s23_s13, 0 }
   0xb   :  { %27 = shalt.err (%p28_p0)  }

</bundles_post_ra>
